<compile_context>
chip_gen: v5e
topology: v5e:2x2
jax: 0.10.0
libtpu: 0.0.40
codegen_flags: <defaults>
</compile_context>

<pallas_src>
import jax
import jax.numpy as jnp
from jax import lax
from jax.experimental import pallas as pl
from jax.experimental.pallas import tpu as pltpu

_LN_EPS = 1e-5  # PyTorch nn.LayerNorm default


def _mpu_kernel(u_ref, p_ref, aux_ref, gamma_ref, beta_ref, w_ref, b_ref,
                out_ref, gate_ref):
    u = u_ref[...].astype(jnp.float32)                      # [bm, D]
    p = p_ref[...].astype(jnp.float32)                      # [bm, D]

    # Stack the two branches along lanes -> one K = 2D matmul (full MXU depth).
    paired = jnp.concatenate([u, p], axis=-1)               # [bm, 2D]

    # LayerNorm(2D) with learned affine.
    mean = jnp.mean(paired, axis=-1, keepdims=True)
    centered = paired - mean
    var = jnp.mean(centered * centered, axis=-1, keepdims=True)
    inv = lax.rsqrt(var + _LN_EPS)
    y = centered * inv * gamma_ref[...] + beta_ref[...]     # [bm, 2D]

    # ReLU -> Linear(2D, F). Weight kept in PyTorch (F, 2D) layout; contract
    # y dim 1 against w dim 1 (i.e. y @ W^T) with no materialised transpose.
    y = jnp.maximum(y, 0.0)
    logits = lax.dot_general(
        y, w_ref[...],
        dimension_numbers=(((1,), (1,)), ((), ())),
        preferred_element_type=jnp.float32)                 # [bm, F]
    logits = logits + b_ref[...]

    gate = 1.0 / (1.0 + jnp.exp(-logits))                   # sigmoid
    gate = jnp.mean(gate, axis=-1, keepdims=True)           # mean over F -> [bm, 1]
    gate = gate * aux_ref[...]                              # aux gate (ones if None)

    out_ref[...] = (p * gate).astype(out_ref.dtype)
    gate_ref[...] = gate.astype(gate_ref.dtype)


def message_passing_unit(unary, pair, gamma, beta, w, b, aux_gate=None,
                         *, block_rows=256):
    """Pallas implementation of MessagePassingUnit_v1.forward.

    unary, pair : [N, D] (either may be [1, D]; broadcast like the PyTorch code)
    gamma, beta : [2D]   LayerNorm affine parameters
    w           : [F, 2D] nn.Linear weight (PyTorch layout, NOT pre-transposed)
    b           : [F]    nn.Linear bias
    aux_gate    : optional [N]
    Returns (output [N, D], gate [N]).
    """
    # Row-broadcast semantics of the PyTorch forward.
    if unary.shape[0] == 1 and pair.shape[0] > 1:
        unary = jnp.broadcast_to(unary, (pair.shape[0], unary.shape[1]))
    if pair.shape[0] == 1 and unary.shape[0] > 1:
        pair = jnp.broadcast_to(pair, (unary.shape[0], pair.shape[1]))

    N, D = pair.shape
    F = w.shape[0]
    assert unary.shape == (N, D)
    assert gamma.shape == (2 * D,) and beta.shape == (2 * D,)
    assert w.shape == (F, 2 * D) and b.shape == (F,)
    # In-kernel lane concatenation needs each half to be lane-aligned.
    assert D % 128 == 0, "feature dim must be a multiple of 128"

    if aux_gate is None:
        aux2 = jnp.ones((N, 1), jnp.float32)
    else:
        aux2 = jnp.reshape(aux_gate, (N, 1)).astype(jnp.float32)

    # Big row tiles (amortise per-step overhead); ragged N handled by padding.
    # Zero-padded rows are numerically safe (eps in rsqrt) and sliced off below.
    bm = min(block_rows, max(8, pl.cdiv(N, 8) * 8))
    n_pad = pl.cdiv(N, bm) * bm
    if n_pad != N:
        padding = ((0, n_pad - N), (0, 0))
        unary = jnp.pad(unary, padding)
        pair = jnp.pad(pair, padding)
        aux2 = jnp.pad(aux2, padding)

    gamma2 = gamma.reshape(1, 2 * D)
    beta2 = beta.reshape(1, 2 * D)
    b2 = b.reshape(1, F)

    grid = (n_pad // bm,)
    row_spec = pl.BlockSpec((bm, D), lambda i: (i, 0))          # lane-dense
    aux_spec = pl.BlockSpec((bm, 1), lambda i: (i, 0))
    ln_spec = pl.BlockSpec((1, 2 * D), lambda i: (0, 0))        # constant block
    w_spec = pl.BlockSpec((F, 2 * D), lambda i: (0, 0))         # constant block
    bias_spec = pl.BlockSpec((1, F), lambda i: (0, 0))          # constant block
    gate_spec = pl.BlockSpec((bm, 1), lambda i: (i, 0))

    out, gate = pl.pallas_call(
        _mpu_kernel,
        out_shape=(jax.ShapeDtypeStruct((n_pad, D), pair.dtype),
                   jax.ShapeDtypeStruct((n_pad, 1), jnp.float32)),
        grid_spec=pltpu.PrefetchScalarGridSpec(
            num_scalar_prefetch=0,
            grid=grid,
            in_specs=[row_spec, row_spec, aux_spec, ln_spec, ln_spec,
                      w_spec, bias_spec],
            out_specs=(row_spec, gate_spec),
        ),
        compiler_params=pltpu.CompilerParams(
            dimension_semantics=("parallel",)),
    )(unary, pair, aux2, gamma2, beta2, w, b2)

    return out[:N], gate[:N, 0]


def mpu_ref(unary, pair, gamma, beta, w, b, aux_gate=None):
    """Pure-JAX reference matching the PyTorch module exactly."""
    if unary.shape[0] == 1 and pair.shape[0] > 1:
        unary = jnp.broadcast_to(unary, (pair.shape[0], unary.shape[1]))
    if pair.shape[0] == 1 and unary.shape[0] > 1:
        pair = jnp.broadcast_to(pair, (unary.shape[0], pair.shape[1]))
    paired = jnp.concatenate([unary, pair], axis=1)
    mean = paired.mean(-1, keepdims=True)
    var = ((paired - mean) ** 2).mean(-1, keepdims=True)
    y = (paired - mean) / jnp.sqrt(var + _LN_EPS) * gamma + beta
    y = jnp.maximum(y, 0.0)
    logits = y @ w.T + b
    gate = jax.nn.sigmoid(logits)
    gate = gate.mean(1) if gate.shape[1] > 1 else gate[:, 0]
    if aux_gate is not None:
        gate = gate * aux_gate
    out = pair * gate[:, None]
    return out, gate


# Note: self.gate_weight / self.aux_gate_weight are defined in the PyTorch
# module but never used in forward(), so they are intentionally not inputs here.

if __name__ == "__main__":
    key = jax.random.PRNGKey(0)
    N, D, F = 10, 128, 64   # ragged N exercises the padding path; F = filter_dim

    k = jax.random.split(key, 7)
    unary = jax.random.normal(k[0], (N, D), jnp.float32)
    pair = jax.random.normal(k[1], (N, D), jnp.float32)
    gamma = 1.0 + 0.1 * jax.random.normal(k[2], (2 * D,), jnp.float32)
    beta = 0.1 * jax.random.normal(k[3], (2 * D,), jnp.float32)
    w = 0.05 * jax.random.normal(k[4], (F, 2 * D), jnp.float32)
    b = 0.05 * jax.random.normal(k[5], (F,), jnp.float32)
    aux = jax.nn.sigmoid(jax.random.normal(k[6], (N,), jnp.float32))

    # Plain path (aux_gate=None).
    out, gate = message_passing_unit(unary, pair, gamma, beta, w, b)
    out, gate = jax.block_until_ready((out, gate))
    ref_out, ref_gate = mpu_ref(unary, pair, gamma, beta, w, b)
    assert out.shape == (N, D) and gate.shape == (N,)
    assert jnp.allclose(out, ref_out, atol=1e-4, rtol=1e-4), "output mismatch"
    assert jnp.allclose(gate, ref_gate, atol=1e-4, rtol=1e-4), "gate mismatch"

    # Broadcast path (unary has 1 row) with aux_gate.
    out2, gate2 = message_passing_unit(unary[:1], pair, gamma, beta, w, b,
                                       aux_gate=aux)
    out2, gate2 = jax.block_until_ready((out2, gate2))
    ref_out2, ref_gate2 = mpu_ref(unary[:1], pair, gamma, beta, w, b,
                                  aux_gate=aux)
    assert jnp.allclose(out2, ref_out2, atol=1e-4, rtol=1e-4), "output mismatch (bcast)"
    assert jnp.allclose(gate2, ref_gate2, atol=1e-4, rtol=1e-4), "gate mismatch (bcast)"

    print("KERNEL_OK")
</pallas_src>

<mosaic_0001>
module attributes {stable_mosaic.version = 11 : i64} {
  func.func @_mpu_kernel(%arg0: i32, %arg1: memref<16x128xf32, #tpu.memory_space<vmem>>, %arg2: memref<16x128xf32, #tpu.memory_space<vmem>>, %arg3: memref<16x1xf32, #tpu.memory_space<vmem>>, %arg4: memref<1x256xf32, #tpu.memory_space<vmem>>, %arg5: memref<1x256xf32, #tpu.memory_space<vmem>>, %arg6: memref<64x256xf32, #tpu.memory_space<vmem>>, %arg7: memref<1x64xf32, #tpu.memory_space<vmem>>, %arg8: memref<16x128xf32, #tpu.memory_space<vmem>>, %arg9: memref<16x1xf32, #tpu.memory_space<vmem>>) attributes {dimension_semantics = [#tpu.dimension_semantics<parallel>], iteration_bounds = array<i64: 1>, scalar_prefetch = 0 : i64, scratch_operands = 0 : i64, tpu.core_type = #tpu.core_type<tc>, window_params = [{transform_indices = @transform_0, window_bounds = array<i64: 16, 128>}, {transform_indices = @transform_1, window_bounds = array<i64: 16, 128>}, {transform_indices = @transform_2, window_bounds = array<i64: 16, 1>}, {pipeline_mode = #tpu.pipeline_mode<synchronous>, transform_indices = @transform_3, window_bounds = array<i64: 1, 256>}, {pipeline_mode = #tpu.pipeline_mode<synchronous>, transform_indices = @transform_4, window_bounds = array<i64: 1, 256>}, {pipeline_mode = #tpu.pipeline_mode<synchronous>, transform_indices = @transform_5, window_bounds = array<i64: 64, 256>}, {pipeline_mode = #tpu.pipeline_mode<synchronous>, transform_indices = @transform_6, window_bounds = array<i64: 1, 64>}, {transform_indices = @transform_7, window_bounds = array<i64: 16, 128>}, {transform_indices = @transform_8, window_bounds = array<i64: 16, 1>}]} {
    %c0 = arith.constant 0 : index
    %c0_0 = arith.constant 0 : index
    %0 = vector.load %arg1[%c0, %c0_0] : memref<16x128xf32, #tpu.memory_space<vmem>>, vector<16x128xf32>
    %c0_1 = arith.constant 0 : index
    %c0_2 = arith.constant 0 : index
    %1 = vector.load %arg2[%c0_1, %c0_2] : memref<16x128xf32, #tpu.memory_space<vmem>>, vector<16x128xf32>
    %2 = tpu.concatenate %0, %1 in 1 : vector<16x128xf32>, vector<16x128xf32> -> vector<16x256xf32>
    %cst = arith.constant dense<0.000000e+00> : vector<16xf32>
    %3 = vector.multi_reduction <add>, %2, %cst [1] : vector<16x256xf32> to vector<16xf32>
    %4 = vector.shape_cast %3 : vector<16xf32> to vector<16x1xf32>
    %cst_3 = arith.constant 2.560000e+02 : f32
    %5 = vector.broadcast %cst_3 : f32 to vector<16x1xf32>
    %6 = arith.divf %4, %5 : vector<16x1xf32>
    %7 = vector.broadcast %6 : vector<16x1xf32> to vector<16x256xf32>
    %8 = arith.subf %2, %7 : vector<16x256xf32>
    %9 = arith.mulf %8, %8 : vector<16x256xf32>
    %cst_4 = arith.constant dense<0.000000e+00> : vector<16xf32>
    %10 = vector.multi_reduction <add>, %9, %cst_4 [1] : vector<16x256xf32> to vector<16xf32>
    %11 = vector.shape_cast %10 : vector<16xf32> to vector<16x1xf32>
    %cst_5 = arith.constant 2.560000e+02 : f32
    %12 = vector.broadcast %cst_5 : f32 to vector<16x1xf32>
    %13 = arith.divf %11, %12 : vector<16x1xf32>
    %cst_6 = arith.constant 9.99999974E-6 : f32
    %14 = vector.broadcast %cst_6 : f32 to vector<16x1xf32>
    %15 = arith.addf %13, %14 : vector<16x1xf32>
    %16 = math.rsqrt %15 : vector<16x1xf32>
    %17 = vector.broadcast %16 : vector<16x1xf32> to vector<16x256xf32>
    %18 = arith.mulf %8, %17 : vector<16x256xf32>
    %c0_7 = arith.constant 0 : index
    %c0_8 = arith.constant 0 : index
    %19 = vector.load %arg4[%c0_7, %c0_8] : memref<1x256xf32, #tpu.memory_space<vmem>>, vector<1x256xf32>
    %20 = vector.broadcast %19 : vector<1x256xf32> to vector<16x256xf32>
    %21 = arith.mulf %18, %20 : vector<16x256xf32>
    %c0_9 = arith.constant 0 : index
    %c0_10 = arith.constant 0 : index
    %22 = vector.load %arg5[%c0_9, %c0_10] : memref<1x256xf32, #tpu.memory_space<vmem>>, vector<1x256xf32>
    %23 = vector.broadcast %22 : vector<1x256xf32> to vector<16x256xf32>
    %24 = arith.addf %21, %23 : vector<16x256xf32>
    %cst_11 = arith.constant 0.000000e+00 : f32
    %25 = vector.broadcast %cst_11 : f32 to vector<16x256xf32>
    %26 = arith.maximumf %24, %25 : vector<16x256xf32>
    %c0_12 = arith.constant 0 : index
    %c0_13 = arith.constant 0 : index
    %27 = vector.load %arg6[%c0_12, %c0_13] : memref<64x256xf32, #tpu.memory_space<vmem>>, vector<64x256xf32>
    %cst_14 = arith.constant dense<0.000000e+00> : vector<16x64xf32>
    %28 = tpu.matmul %26, %27, %cst_14 {dimension_numbers = #tpu.dot_dimension_numbers<[1], [1], [0], [0], [0, 0, 1, 0], [], []>} : vector<16x256xf32>, vector<64x256xf32>, vector<16x64xf32> -> vector<16x64xf32>
    %c0_15 = arith.constant 0 : index
    %c0_16 = arith.constant 0 : index
    %29 = vector.load %arg7[%c0_15, %c0_16] : memref<1x64xf32, #tpu.memory_space<vmem>>, vector<1x64xf32>
    %30 = vector.broadcast %29 : vector<1x64xf32> to vector<16x64xf32>
    %31 = arith.addf %28, %30 : vector<16x64xf32>
    %cst_17 = arith.constant 0.000000e+00 : f32
    %32 = vector.broadcast %cst_17 : f32 to vector<16x64xf32>
    %33 = arith.subf %32, %31 : vector<16x64xf32>
    %34 = math.exp %33 : vector<16x64xf32>
    %cst_18 = arith.constant 1.000000e+00 : f32
    %35 = vector.broadcast %cst_18 : f32 to vector<16x64xf32>
    %36 = arith.addf %35, %34 : vector<16x64xf32>
    %cst_19 = arith.constant 1.000000e+00 : f32
    %37 = vector.broadcast %cst_19 : f32 to vector<16x64xf32>
    %38 = arith.divf %37, %36 : vector<16x64xf32>
    %cst_20 = arith.constant dense<0.000000e+00> : vector<16xf32>
    %39 = vector.multi_reduction <add>, %38, %cst_20 [1] : vector<16x64xf32> to vector<16xf32>
    %40 = vector.shape_cast %39 : vector<16xf32> to vector<16x1xf32>
    %cst_21 = arith.constant 6.400000e+01 : f32
    %41 = vector.broadcast %cst_21 : f32 to vector<16x1xf32>
    %42 = arith.divf %40, %41 : vector<16x1xf32>
    %c0_22 = arith.constant 0 : index
    %c0_23 = arith.constant 0 : index
    %43 = vector.load %arg3[%c0_22, %c0_23] : memref<16x1xf32, #tpu.memory_space<vmem>>, vector<16x1xf32>
    %44 = arith.mulf %42, %43 : vector<16x1xf32>
    %45 = vector.broadcast %44 : vector<16x1xf32> to vector<16x128xf32>
    %46 = arith.mulf %1, %45 : vector<16x128xf32>
    %c0_24 = arith.constant 0 : index
    %c0_25 = arith.constant 0 : index
    %47 = vector.load %arg8[%c0_24, %c0_25] : memref<16x128xf32, #tpu.memory_space<vmem>>, vector<16x128xf32>
    tpu.vector_store %arg8[%c0_24, %c0_25], %46 {strides = array<i32>} : memref<16x128xf32, #tpu.memory_space<vmem>>, vector<16x128xf32>,
    %c0_26 = arith.constant 0 : index
    %c0_27 = arith.constant 0 : index
    %48 = vector.load %arg9[%c0_26, %c0_27] : memref<16x1xf32, #tpu.memory_space<vmem>>, vector<16x1xf32>
    tpu.vector_store %arg9[%c0_26, %c0_27], %44 {strides = array<i32>} : memref<16x1xf32, #tpu.memory_space<vmem>>, vector<16x1xf32>,
    return
  }
  func.func @transform_0(%arg0: i32) -> (i32, i32) {
    %c0_i32 = arith.constant 0 : i32
    %c0_i32_0 = arith.constant 0 : i32
    return %arg0, %c0_i32 : i32, i32
  }
  func.func @transform_1(%arg0: i32) -> (i32, i32) {
    %c0_i32 = arith.constant 0 : i32
    %c0_i32_0 = arith.constant 0 : i32
    return %arg0, %c0_i32 : i32, i32
  }
  func.func @transform_2(%arg0: i32) -> (i32, i32) {
    %c0_i32 = arith.constant 0 : i32
    %c0_i32_0 = arith.constant 0 : i32
    return %arg0, %c0_i32 : i32, i32
  }
  func.func @transform_3(%arg0: i32) -> (i32, i32) {
    %c0_i32 = arith.constant 0 : i32
    %c0_i32_0 = arith.constant 0 : i32
    %c0_i32_1 = arith.constant 0 : i32
    return %c0_i32, %c0_i32_0 : i32, i32
  }
  func.func @transform_4(%arg0: i32) -> (i32, i32) {
    %c0_i32 = arith.constant 0 : i32
    %c0_i32_0 = arith.constant 0 : i32
    %c0_i32_1 = arith.constant 0 : i32
    return %c0_i32, %c0_i32_0 : i32, i32
  }
  func.func @transform_5(%arg0: i32) -> (i32, i32) {
    %c0_i32 = arith.constant 0 : i32
    %c0_i32_0 = arith.constant 0 : i32
    %c0_i32_1 = arith.constant 0 : i32
    return %c0_i32, %c0_i32_0 : i32, i32
  }
  func.func @transform_6(%arg0: i32) -> (i32, i32) {
    %c0_i32 = arith.constant 0 : i32
    %c0_i32_0 = arith.constant 0 : i32
    %c0_i32_1 = arith.constant 0 : i32
    return %c0_i32, %c0_i32_0 : i32, i32
  }
  func.func @transform_7(%arg0: i32) -> (i32, i32) {
    %c0_i32 = arith.constant 0 : i32
    %c0_i32_0 = arith.constant 0 : i32
    return %arg0, %c0_i32 : i32, i32
  }
  func.func @transform_8(%arg0: i32) -> (i32, i32) {
    %c0_i32 = arith.constant 0 : i32
    %c0_i32_0 = arith.constant 0 : i32
    return %arg0, %c0_i32 : i32, i32
  }
}

</mosaic_0001>

<bundles_post_ra>
// kernel: tpu_custom_call.1
= control target key start
LH: loop header
LB: loop body
LE: loop exit
PB: predicated region body
PF: predicated region fallthrough
CT: control target
= control target key end

     0   :  { %14 = vsyncpa [#allocation3], 0  ;;  %s606_s0 = inlined_call_operand.vmem [shape: f32[16,128], index: 0, kind: input, shape index: {}]   ;;  %s607_s1 = inlined_call_operand.hbm [shape: f32[16,128], index: 1, kind: input, shape index: {}]   ;;  %s608_s2 = inlined_call_operand.vmem [shape: f32[16,1], index: 2, kind: input, shape index: {}]   ;;  %s609_s3 = inlined_call_operand.hbm [shape: f32[1,256], index: 3, kind: input, shape index: {}]   ;;  %s610_s4 = inlined_call_operand.vmem [shape: f32[1,256], index: 4, kind: input, shape index: {}]   ;;  %s611_s5 = inlined_call_operand.hbm [shape: f32[64,256], index: 5, kind: input, shape index: {}]   ;;  %s612_s6 = inlined_call_operand.vmem [shape: f32[1,64], index: 6, kind: input, shape index: {}]   ;;  %s613_s7 = inlined_call_operand.hbm [shape: f32[16,128], index: 7, kind: output, shape index: {0}]   ;;  %s614_s8 = inlined_call_operand.vmem [shape: f32[16,1], index: 8, kind: output, shape index: {1}]  }
   0x1   :  { %15 = vsyncpa [#allocation6], 0  ;;  %s39_s29 = sshll.u32 %s609_s3, 4  ;;  %s40_s29 = int_to_ptr.hbm [resolvable:$true] %s39_s29 }
   0x2   :  { %16 = vsyncpa [#allocation4], 0  ;;  %s472_s30 = smov [#allocation5]   ;;  %s23_s12 = sshll.u32 %s607_s1, 4  ;;  %s24_s12 = int_to_ptr.hbm [resolvable:$true] %s23_s12 }
   0x3   :  { %s41_s9 = sshll.u32 %s472_s30, 4  ;;  %s473_s13 = smov [#allocation2]   ;;  %s42_s9 = int_to_ptr.vmem [resolvable:$true] %s41_s9 }
   0x4   :  { %44 = dma.hbm_to_vmem [thread:$0]  %s40_s29, 32, %s42_s9, [#allocation6]  }
   0x5   :  { %s25_s14 = sshll.u32 %s473_s13, 4  ;;  %s474_s15 = smov 128   ;;  %s26_s14 = int_to_ptr.vmem [resolvable:$true] %s25_s14 }
   0x6   :  { %s475_s16 = smov 8   ;;  %s51_s18 = sshll.u32 %s611_s5, 4  ;;  %s52_s18 = int_to_ptr.hbm [resolvable:$true] %s51_s18 }
   0x7   :  { %31 = dma.hbm_to_vmem [thread:$0]  %s24_s12, 256, %s26_s14, [#allocation3], %s474_s15, %s474_s15, %s475_s16  }
   0x8   :  { %s476_s19 = smov [#allocation7]   ;;  %s477_s1 = smov 256  }
   0x9   :  { %s53_s20 = sshll.u32 %s476_s19, 4  ;;  %s478_s21 = smov 16   ;;  %s54_s20 = int_to_ptr.vmem [resolvable:$true] %s53_s20 }
   0xa   :  { %59 = dma.hbm_to_vmem [thread:$0]  %s52_s18, 2048, %s54_s20, [#allocation6], %s477_s1, %s477_s1, %s478_s21  }
   0xb   :  { %466 = dma.done.wait [#allocation3], 256  }
   0xc   :  { %467 = vsyncadd [#allocation3], 4294967040 }
   0xd   :  { %468 = dma.done.wait [#allocation6], 2080  }
   0xe   :  { %469 = vsyncadd [#allocation6], 4294965216  ;;  %v75_v0 = vld [vmem:[%s606_s0 + $0x8] sm:$0xff]  ;;  %v74_v3 = vld [vmem:[%s606_s0] sm:$0xff]  ;;  %v479_v6 = vmov 256.0   ;;  %vm263_vm12 = vcmask 523264  }
   0xf   :  { %v543_v1 = vld [vmem:[#allocation2 + $0x8] sm:$0xff]  ;;  %v549_v4 = vld [vmem:[#allocation2] sm:$0xff]  ;;  %354 = vrcp.f32 %v479_v6  ;;  %v171_v29 = vld [vmem:[#allocation7 + $0x60] sm:$0xff]  ;;  %s482_s12 = smov [#allocation8]   ;;  %s306_s17 = sshll.u32 %s613_s7, 4  ;;  %s307_s17 = int_to_ptr.hbm [resolvable:$true] %s306_s17 }
  0x10   :  { %v81_v2 = vadd.f32 %v543_v1, %v75_v0  ;;  %v78_v5 = vadd.f32 %v549_v4, %v74_v3  ;;  %v173_v9 = vld [vmem:[#allocation7 + $0x70] sm:$0xff]  ;;  %v174_v10 = vld [vmem:[#allocation7 + $0x78] sm:$0xff]  ;;  %v172_v30 = vld [vmem:[#allocation7 + $0x68] sm:$0xff]  ;;  %s304_s13 = sshll.u32 %s482_s12, 4  ;;  %s305_s13 = int_to_ptr.vmem [resolvable:$true] %s304_s13 }
  0x11   :  { %324 = vmatpush.xpose.msra.mxu2 %v173_v9  ;;  %332 = vmatpush.xpose.msra.mxu3 %v174_v10  ;;  %v169_v31 = vld [vmem:[#allocation7 + $0x50] sm:$0xff]  ;;  %v170_v32 = vld [vmem:[#allocation7 + $0x58] sm:$0xff]  ;;  %v167_v33 = vld [vmem:[#allocation7 + $0x40] sm:$0xff] }
  0x12   :  { %82 = vadd.xlane.f32.xlu0 %v81_v2  ;;  %187 = vmatpush.xpose.msra.mxu0 %v173_v9  ;;  %v168_v34 = vld [vmem:[#allocation7 + $0x48] sm:$0xff]  ;;  %v165_v35 = vld [vmem:[#allocation7 + $0x30] sm:$0xff]  ;;  %v166_v36 = vld [vmem:[#allocation7 + $0x38] sm:$0xff] }
  0x13   :  { %210 = vmatpush.xpose.msra.mxu1 %v174_v10  ;;  %v163_v37 = vld [vmem:[#allocation7 + $0x20] sm:$0xff]  ;;  %v164_v38 = vld [vmem:[#allocation7 + $0x28] sm:$0xff]  ;;  %v161_v39 = vld [vmem:[#allocation7 + $0x10] sm:$0xff] }
  0x14   :  { %v162_v40 = vld [vmem:[#allocation7 + $0x18] sm:$0xff]  ;;  %v159_v41 = vld [vmem:[#allocation7] sm:$0xff]  ;;  %v160_v42 = vld [vmem:[#allocation7 + $0x8] sm:$0xff] }
  0x15   :  { %v355_v7 = vpop.eup %354  ;;  %325 = vmatpush.xpose.msra.mxu2 %v171_v29  ;;  %333 = vmatpush.xpose.msra.mxu3 %v172_v30  ;;  %v135_v54 = vld [vmem:[#allocation5] sm:$0x3]  ;;  %v145_v58 = vld [vmem:[%s610_s4] sm:$0x3] }
  0x16   :  { %v85_v8 = vmul.f32 256.0, %v355_v7  ;;  %vm89_vm0 = vweird.f32 %v355_v7  ;;  %188 = vmatpush.xpose.msra.mxu0 %v171_v29  ;;  %v137_v59 = vperm.slane %v135_v54, 0  ;;  %v138_v60 = vperm.slane %v135_v54, 1 }
  0x17   :  { %211 = vmatpush.xpose.msra.mxu1 %v172_v30 }
  0x18   :  { %v86_v11 = vsub.f32 1.0, %v85_v8 }
  0x19   :  { %326 = vmatpush.xpose.msra.mxu2 %v169_v31  ;;  %334 = vmatpush.xpose.msra.mxu3 %v170_v32 }
  0x1a   :  { %79 = vadd.xlane.f32.xlu0 %v78_v5  ;;  %v87_v12 = vmul.f32 %v355_v7, %v86_v11  ;;  %189 = vmatpush.xpose.msra.mxu0 %v169_v31 }
  0x1b   :  { %212 = vmatpush.xpose.msra.mxu1 %v170_v32 }
  0x1c   :  { %v88_v13 = vadd.f32 %v355_v7, %v87_v12 }
  0x1d   :  { %327 = vmatpush.xpose.msra.mxu2 %v167_v33  ;;  %335 = vmatpush.xpose.msra.mxu3 %v168_v34 }
  0x1e   :  { %v552_v14 = vsel %vm89_vm0, %v355_v7, %v88_v13  ;;  %190 = vmatpush.xpose.msra.mxu0 %v167_v33 }
  0x1f   :  { %213 = vmatpush.xpose.msra.mxu1 %v168_v34 }
  0x21   :  { %328 = vmatpush.xpose.msra.mxu2 %v165_v35  ;;  %336 = vmatpush.xpose.msra.mxu3 %v166_v36 }
  0x22   :  { %191 = vmatpush.xpose.msra.mxu0 %v165_v35 }
  0x23   :  { %214 = vmatpush.xpose.msra.mxu1 %v166_v36 }
  0x25   :  { %329 = vmatpush.xpose.msra.mxu2 %v163_v37  ;;  %337 = vmatpush.xpose.msra.mxu3 %v164_v38 }
  0x26   :  { %192 = vmatpush.xpose.msra.mxu0 %v163_v37 }
  0x27   :  { %215 = vmatpush.xpose.msra.mxu1 %v164_v38 }
  0x29   :  { %330 = vmatpush.xpose.msra.mxu2 %v161_v39  ;;  %338 = vmatpush.xpose.msra.mxu3 %v162_v40 }
  0x2a   :  { %193 = vmatpush.xpose.msra.mxu0 %v161_v39 }
  0x2b   :  { %216 = vmatpush.xpose.msra.mxu1 %v162_v40 }
  0x2d   :  { %331 = vmatpush.xpose.msra.mxu2 %v159_v41  ;;  %339 = vmatpush.xpose.msra.mxu3 %v160_v42 }
  0x2e   :  { %194 = vmatpush.xpose.msra.mxu0 %v159_v41 }
  0x2f   :  { %217 = vmatpush.xpose.msra.mxu1 %v160_v42 }
  0x85   :  { %v83_v15 = vpop.xlane.xlu0 %82 }
  0x86   :  { %v92_v16 = vmul.f32 %v552_v14, %v83_v15 }
  0x88   :  { %v555_v17 = vsub.f32 %v75_v0, %v92_v16  ;;  %v558_v18 = vsub.f32 %v543_v1, %v92_v16  ;;  %v147_v0 = vperm.slane %v145_v58, 0 }
  0x8a   :  { %v99_v19 = vmul.f32 %v555_v17, %v555_v17  ;;  %v100_v20 = vmul.f32 %v558_v18, %v558_v18 }
  0x8c   :  { %v104_v21 = vadd.f32 %v100_v20, %v99_v19 }
  0x8d   :  { %v80_v22 = vpop.xlane.xlu0 %79 }
  0x8e   :  { %v91_v23 = vmul.f32 %v552_v14, %v80_v22  ;;  %105 = vadd.xlane.f32.xlu1 %v104_v21 }
  0x90   :  { %v565_v24 = vsub.f32 %v74_v3, %v91_v23  ;;  %v568_v25 = vsub.f32 %v549_v4, %v91_v23  ;;  %v148_v3 = vperm.slane %v145_v58, 1  ;;  %v353_v23 = vld [vmem:[%s612_s6] ss:$0 sm:$0xff] }
  0x92   :  { %v97_v26 = vmul.f32 %v565_v24, %v565_v24  ;;  %v98_v27 = vmul.f32 %v568_v25, %v568_v25 }
  0x94   :  { %v101_v28 = vadd.f32 %v98_v27, %v97_v26 }
  0x96   :  { %102 = vadd.xlane.f32.xlu1 %v101_v28 }
 0x101   :  { %v106_v43 = vpop.xlane.xlu1 %105 }
 0x102   :  { %v108_v44 = vmul.f32 %v106_v43, %v552_v14 }
 0x104   :  { %v110_v45 = vadd.f32 1e-05, %v108_v44 }
 0x106   :  { %356 = vrsqrt.f32 %v110_v45  ;;  %vm127_vm2 = vweird.f32 %v110_v45 }
 0x109   :  { %v103_v46 = vpop.xlane.xlu1 %102 }
 0x10a   :  { %v107_v47 = vmul.f32 %v103_v46, %v552_v14 }
 0x10c   :  { %v357_v48 = vpop.eup %356  ;;  %v109_v49 = vadd.f32 1e-05, %v107_v47 }
 0x10d   :  { %v122_v50 = vmul.f32 %v357_v48, %v110_v45  ;;  %vm128_vm1 = vweird.f32 %v357_v48 }
 0x10e   :  { %358 = vrsqrt.f32 %v109_v49  ;;  %vm129_vm3 = vmor %vm127_vm2, %vm128_vm1  ;;  %vm117_vm5 = vweird.f32 %v109_v49  ;;  %vm297_vm1 = vcmask 7168  }
 0x10f   :  { %v123_v51 = vmul.f32 %v357_v48, %v122_v50 }
 0x111   :  { %v124_v52 = vmul.f32 0.5, %v123_v51 }
 0x113   :  { %v125_v53 = vsub.f32 1.5, %v124_v52 }
 0x114   :  { %v359_v55 = vpop.eup %358 }
 0x115   :  { %v126_v56 = vmul.f32 %v357_v48, %v125_v53  ;;  %v112_v57 = vmul.f32 %v359_v55, %v109_v49  ;;  %vm118_vm4 = vweird.f32 %v359_v55 }
 0x116   :  { %vm119_vm6 = vmor %vm117_vm5, %vm118_vm4 }
 0x117   :  { %v113_v61 = vmul.f32 %v359_v55, %v112_v57  ;;  %v130_v62 = vsel %vm129_vm3, %v357_v48, %v126_v56 }
 0x118   :  { %v133_v63 = vmul.f32 %v130_v62, %v555_v17  ;;  %v134_v2 = vmul.f32 %v130_v62, %v558_v18  ;;  %v480_v62 = vmov 64.0  }
 0x119   :  { %v114_v5 = vmul.f32 0.5, %v113_v61 }
 0x11a   :  { %v143_v6 = vmul.f32 %v137_v59, %v133_v63  ;;  %v144_v7 = vmul.f32 %v138_v60, %v134_v2  ;;  %v481_v63 = vmov 0  }
 0x11b   :  { %v115_v8 = vsub.f32 1.5, %v114_v5  ;;  %351 = vset.pattern.permute.xlu0 %v481_v63  ;;  %352 = vset.pattern.permute.xlu1 %v481_v63 }
 0x11c   :  { %v153_v9 = vadd.f32 %v147_v0, %v143_v6  ;;  %v154_v10 = vadd.f32 %v148_v3, %v144_v7 }
 0x11d   :  { %v116_v11 = vmul.f32 %v359_v55, %v115_v8  ;;  %v279_v8 = vld [vmem:[%s608_s2] sm:$0xff] }
 0x11e   :  { %v157_v12 = vmax.f32 %v153_v9, 0.0  ;;  %v158_v13 = vmax.f32 %v154_v10, 0.0 }
 0x11f   :  { %v120_v14 = vsel %vm119_vm6, %v359_v55, %v116_v11 }
 0x120   :  { %198 = vmatmul.f32.vlgmr.msra.gmra.mxu2 %v157_v12  ;;  %221 = vmatmul.f32.vlgmr.msra.gmra.mxu3 %v158_v13  ;;  %v131_v15 = vmul.f32 %v120_v14, %v565_v24  ;;  %v132_v16 = vmul.f32 %v120_v14, %v568_v25  ;;  %v280_v12 = vld [vmem:[%s608_s2 + $0x8] sm:$0xff] }
 0x122   :  { %v141_v17 = vmul.f32 %v137_v59, %v131_v15  ;;  %v142_v18 = vmul.f32 %v138_v60, %v132_v16 }
 0x124   :  { %v151_v19 = vadd.f32 %v147_v0, %v141_v17  ;;  %v152_v20 = vadd.f32 %v148_v3, %v142_v18 }
 0x126   :  { %v155_v21 = vmax.f32 %v151_v19, 0.0  ;;  %v156_v22 = vmax.f32 %v152_v20, 0.0 }
 0x128   :  { %195 = vmatmul.f32.vlgmr.msra.gmra.mxu0 %v155_v21  ;;  %218 = vmatmul.f32.vlgmr.msra.gmra.mxu1 %v156_v22 }
 0x1a3   :  { %v199_v26 = vpop.f32.mrf.mxu2  ;;  %v222_v28 = vpop.f32.mrf.mxu3 }
 0x1a4   :  { %v200_v27 = vadd.f32 %v353_v23, %v199_v26 }
 0x1a5   :  { %v196_v29 = vpop.f32.mrf.mxu0  ;;  %v219_v31 = vpop.f32.mrf.mxu1 }
 0x1a6   :  { %v223_v30 = vadd.f32 %v222_v28, %v200_v27  ;;  %v197_v24 = vadd.f32 %v353_v23, %v196_v29 }
 0x1a8   :  { %v226_v25 = vsub.f32 0.0, %v223_v30  ;;  %v220_v32 = vadd.f32 %v219_v31, %v197_v24 }
 0x1aa   :  { %v229_v33 = vmul.f32 1.442695, %v226_v25  ;;  %v225_v34 = vsub.f32 0.0, %v220_v32 }
 0x1ac   :  { %360 = vpow2.f32 %v229_v33  ;;  %v227_v35 = vmul.f32 1.442695, %v225_v34 }
 0x1ae   :  { %362 = vpow2.f32 %v227_v35 }
 0x1b2   :  { %v361_v36 = vpop.eup %360 }
 0x1b3   :  { %v232_v37 = vadd.f32 1.0, %v361_v36 }
 0x1b4   :  { %v363_v38 = vpop.eup %362 }
 0x1b5   :  { %364 = vrcp.f32 %v232_v37  ;;  %v231_v39 = vadd.f32 1.0, %v363_v38  ;;  %v259_v55 = vand.u32 2147483648, %v232_v37  ;;  %vm253_vm13 = vweird.f32 %v232_v37 }
 0x1b6   :  { %v257_v57 = vand.u32 2147483647, %v232_v37 }
 0x1b7   :  { %366 = vrcp.f32 %v231_v39  ;;  %v244_v46 = vand.u32 2147483648, %v231_v39  ;;  %v242_v48 = vand.u32 2147483647, %v231_v39  ;;  %vm238_vm8 = vweird.f32 %v231_v39 }
 0x1b8   :  { %v260_v59 = vor.u32 1.1754944e-38, %v259_v55  ;;  %vm258_vm15 = vcmp.eq.f32.partialorder %v257_v57, 8.507059e+37  ;;  %368 = vrcp.f32 %v480_v62 }
 0x1b9   :  { %v245_v51 = vor.u32 1.1754944e-38, %v244_v46  ;;  %vm243_vm10 = vcmp.eq.f32.partialorder %v242_v48, 8.507059e+37 }
 0x1bb   :  { %v365_v40 = vpop.eup %364 }
 0x1bc   :  { %v249_v41 = vmul.f32 %v365_v40, %v232_v37  ;;  %vm254_vm11 = vweird.f32 %v365_v40 }
 0x1bd   :  { %v367_v42 = vpop.eup %366  ;;  %vm255_vm14 = vmor %vm253_vm13, %vm254_vm11 }
 0x1be   :  { %v234_v43 = vmul.f32 %v367_v42, %v231_v39  ;;  %v250_v44 = vsub.f32 1.0, %v249_v41  ;;  %vm239_vm7 = vweird.f32 %v367_v42  ;;  %v369_v0 = vpop.eup %368 }
 0x1bf   :  { %vm240_vm9 = vmor %vm238_vm8, %vm239_vm7  ;;  %v271_v2 = vmul.f32 64.0, %v369_v0  ;;  %vm275_vm0 = vweird.f32 %v369_v0 }
 0x1c0   :  { %v235_v45 = vsub.f32 1.0, %v234_v43  ;;  %v251_v49 = vmul.f32 %v365_v40, %v250_v44 }
 0x1c1   :  { %v272_v3 = vsub.f32 1.0, %v271_v2 }
 0x1c2   :  { %v236_v47 = vmul.f32 %v367_v42, %v235_v45  ;;  %v252_v53 = vadd.f32 %v365_v40, %v251_v49 }
 0x1c3   :  { %v273_v5 = vmul.f32 %v369_v0, %v272_v3 }
 0x1c4   :  { %v237_v50 = vadd.f32 %v367_v42, %v236_v47  ;;  %v256_v58 = vsel %vm255_vm14, %v365_v40, %v252_v53 }
 0x1c5   :  { %v261_v60 = vsel %vm258_vm15, %v260_v59, %v256_v58  ;;  %v274_v6 = vadd.f32 %v369_v0, %v273_v5 }
 0x1c6   :  { %v241_v52 = vsel %vm240_vm9, %v367_v42, %v237_v50  ;;  %v267_v61 = vsel %vm263_vm12, %v261_v60, 0.0 }
 0x1c7   :  { %v246_v54 = vsel %vm243_vm10, %v245_v51, %v241_v52  ;;  %v276_v7 = vsel %vm275_vm0, %v369_v0, %v274_v6 }
 0x1c8   :  { %v264_v56 = vsel %vm263_vm12, %v246_v54, 0.0 }
 0x1c9   :  { %265 = vadd.xlane.f32.xlu2 %v264_v56 }
 0x1d1   :  { %268 = vadd.xlane.f32.xlu2 %v267_v61 }
 0x23c   :  { %v266_v9 = vpop.xlane.xlu2 %265 }
 0x23d   :  { %v277_v10 = vmul.f32 %v276_v7, %v266_v9 }
 0x23f   :  { %v281_v11 = vmul.f32 %v279_v8, %v277_v10 }
 0x241   :  { %298 = vst.msk [vmem:[%s614_s8] sm:$0xff] %vm297_vm1, %v281_v11  ;;  %285 = vperm.xlu0 %351, %v281_v11  }
 0x244   :  { %v269_v13 = vpop.xlane.xlu2 %268 }
 0x245   :  { %v278_v14 = vmul.f32 %v276_v7, %v269_v13 }
 0x247   :  { %v282_v15 = vmul.f32 %v280_v12, %v278_v14 }
 0x249   :  { %299 = vst.msk [vmem:[%s614_s8 + $0x8] sm:$0xff] %vm297_vm1, %v282_v15  ;;  %290 = vperm.xlu1 %352, %v282_v15  }
 0x2b3   :  { %v286_v16 = vpop.permute.xlu0 %285 }
 0x2b4   :  { %v293_v17 = vmul.f32 %v286_v16, %v549_v4 }
 0x2b6   :  { %295 = vst [vmem:[#allocation8] sm:$0xff] %v293_v17 }
 0x2bb   :  { %v291_v18 = vpop.permute.xlu1 %290 }
 0x2bc   :  { %v294_v19 = vmul.f32 %v291_v18, %v543_v1 }
 0x2be   :  { %296 = vst [vmem:[#allocation8 + $0x8] sm:$0xff] %v294_v19 }
 0x2bf   :  { %312 = dma.vmem_to_hbm [thread:$0]  %s305_s13, 256, %s307_s17, [#allocation4], %s474_s15, %s474_s15, %s475_s16  }
 0x2c0   :  { %470 = dma.done.wait [#allocation4], 256  }
 0x2c1   :  { %471 = vsyncadd [#allocation4], 4294967040 }
 0x2c2   :  { %321 = vsyncpa [#allocation3], 1 }
 0x2c3   :  { %322 = vsyncpa [#allocation6], 1 }
 0x2c4   :  { %323 = vsyncpa [#allocation4], 1 }

</bundles_post_ra>
